<compile_context>
chip_gen: v7x
topology: tpu7x:2x2x1
jax: 0.10.0
libtpu: 0.0.40
codegen_flags: <defaults>
</compile_context>

<pallas_src>
import functools

import jax
import jax.numpy as jnp
from jax.experimental import pallas as pl
from jax.experimental.pallas import tpu as pltpu


def _round_up(n, m):
    return -(-n // m) * m


def temporal_block_kernel(xb_ref, xh_ref, w1_ref, b1_ref, w2_ref, b2_ref, o_ref,
                          xcat_ref, h1_ref, *, K, dilation, padding, halo, matmul_dtype):
    """One (batch, L-tile) pair per grid step.

    xb_ref  : (C_in, TL)         body of the tile: x columns [j*TL, (j+1)*TL)
    xh_ref  : (C_in, HALO)       left halo: x columns [j*TL - HALO, j*TL), zeros for tile 0
    w1_ref  : (K, C_out, C_in)   weight-norm'd conv1 taps
    w2_ref  : (K, C_out, C_out)  weight-norm'd conv2 taps
    b*_ref  : (C_out, 1)         float32 biases
    o_ref   : (C_out, TL)
    xcat_ref: (C_in, HALO+TL)    scratch: x staged once in the matmul dtype
    h1_ref  : (C_out, TL+P)      scratch: conv1 activation staged for conv2
    """
    P = padding
    TL = o_ref.shape[1]
    W = TL + P                         # h1 columns needed by conv2: global [j*TL - P, (j+1)*TL)
    j = pl.program_id(1)

    # Stage x = [halo | body] once, single cast pass (both stores are lane-aligned: halo % 128 == 0).
    xcat_ref[:, :halo] = xh_ref[...].astype(matmul_dtype)
    xcat_ref[:, halo:] = xb_ref[...].astype(matmul_dtype)

    # ---- conv1: K accumulating tap matmuls over static windows of xcat -----------------------
    # xcat column c holds x[:, j*TL - halo + c]; h1 column u is global g = j*TL - P + u and needs
    # x[:, g - P + k*d], i.e. xcat column (halo - 2P + k*d) + u.
    acc1 = None
    for k in range(K):
        off = halo - 2 * P + k * dilation
        t = jnp.dot(w1_ref[k], xcat_ref[:, off:off + W],
                    preferred_element_type=jnp.float32)
        acc1 = t if acc1 is None else acc1 + t
    h1 = jnp.maximum(acc1 + b1_ref[...], 0.0)            # (C_out, TL+P), f32
    h1_ref[...] = h1.astype(matmul_dtype)

    # Causal left zero-padding of conv2's input (torch pad+chomp semantics): h1 columns whose
    # global index is < 0 must read as zero.  Only the first P columns of tile 0 qualify.
    @pl.when(j == 0)
    def _():
        h1_ref[:, :P] = jnp.zeros((h1_ref.shape[0], P), matmul_dtype)

    # ---- conv2: same accumulating structure on the staged h1 ---------------------------------
    acc2 = None
    for k in range(K):
        s = k * dilation
        t = jnp.dot(w2_ref[k], h1_ref[:, s:s + TL],
                    preferred_element_type=jnp.float32)
        acc2 = t if acc2 is None else acc2 + t
    h2 = jnp.maximum(acc2 + b2_ref[...], 0.0)             # (C_out, TL), f32

    # ---- residual add + final ReLU (residual of this tile == body block, kept f32-exact) -----
    o_ref[...] = jnp.maximum(h2 + xb_ref[...].astype(jnp.float32), 0.0).astype(o_ref.dtype)


def _effective_weight(v, g):
    # torch.nn.utils.weight_norm (dim=0): w = g * v / ||v||, norm over (in, k) per out channel.
    # NOTE: matches torch exactly (no eps); an all-zero v row yields inf/NaN there too.
    norm = jnp.sqrt(jnp.sum(v * v, axis=(1, 2), keepdims=True))
    return g * v / norm


def _vmem_capacity_bytes():
    """Physical VMEM per TensorCore (v5e/v5p/v6e: 128 MiB, v7x: 64 MiB), with robust fallbacks."""
    try:
        cap = getattr(pltpu.get_tpu_info(), "vmem_capacity_bytes", None)
        if cap:
            return int(cap)
    except Exception:
        pass
    try:
        kind = jax.devices()[0].device_kind.lower()
    except Exception:
        kind = ""
    if "v7" in kind or "7x" in kind:
        return 64 << 20
    return 128 << 20


def _need_bytes(tl, C_in, C_out, K, P, halo, x_item, out_item, mm_item):
    """Per-grid-step VMEM working set: double-buffered pipeline blocks, scratches, and the f32
    value chains / relayout temporaries the compiler materializes."""
    w = tl + P
    return int(2 * C_in * tl * x_item                       # x body block
               + 2 * C_in * halo * x_item                   # x halo block
               + 2 * C_out * tl * out_item                  # output block
               + 2 * K * C_out * (C_in + C_out) * mm_item   # weight blocks
               + C_in * (halo + tl) * mm_item               # xcat scratch
               + C_out * w * mm_item                        # h1 scratch
               + 2 * max(C_in, C_out) * w * mm_item         # relayout temps for tap windows
               + 3 * C_out * w * 4)                         # f32 dot-accum / ReLU chains


def _pick_tile_l(L, B, C_in, C_out, K, P, halo, x_item, out_item, mm_item, budget):
    floor_tl = max(128, halo)
    cap = max(floor_tl, _round_up(L, 128))                  # never wider than the padded sequence
    cands = sorted({c for c in (256, 512, 768, 1024, 1536, 2048, 3072, 4096, cap)
                    if floor_tl <= c <= cap})
    tl = floor_tl
    for c in cands:
        if _need_bytes(c, C_in, C_out, K, P, halo, x_item, out_item, mm_item) <= budget:
            tl = max(tl, c)
    # Megacore / 2-TC friendliness (v7x): prefer >= 2 grid steps when the sequence allows it.
    if B * (-(-L // tl)) < 2:
        tl2 = max(floor_tl, _round_up(-(-L // 2), 128))
        if tl2 < tl and -(-L // tl2) >= 2:
            tl = tl2
    return tl


def temporal_block(x, v1, g1, b1, v2, g2, b2, *, kernel_size, stride, dilation, padding,
                   tile_l=None, matmul_dtype=jnp.bfloat16):
    assert stride == 1, "TCN TemporalBlock uses stride=1"  # TODO(synk): general stride support
    B, C_in, L = x.shape
    C_out = v1.shape[0]
    assert C_in == C_out, "residual add requires n_inputs == n_outputs (module has no downsample)"
    K, P = kernel_size, padding
    assert P == dilation * (K - 1) and P >= 1, \
        "causal TCN setting: padding == dilation*(kernel_size-1) >= 1"

    # bf16 MXU operands want 16-row sublane packing; otherwise fall back to f32 (exact path is
    # also available by passing matmul_dtype=jnp.float32 explicitly).
    if jnp.dtype(matmul_dtype) != jnp.dtype(jnp.float32) and (C_in % 16 or C_out % 16):
        matmul_dtype = jnp.float32
    mm_dtype = jnp.dtype(matmul_dtype)

    HALO = _round_up(2 * P, 128)                 # lane-padded halo width (DMA-friendly)

    cap_bytes = _vmem_capacity_bytes()
    budget = (cap_bytes * 5) // 8                # ~40 MiB on v7x, ~80 MiB on v5e/v6e
    if tile_l is None:
        TL = _pick_tile_l(L, B, C_in, C_out, K, P, HALO, x.dtype.itemsize,
                          x.dtype.itemsize, mm_dtype.itemsize, budget)
    else:
        TL = tile_l
    assert TL % 128 == 0 and TL >= max(2 * P, HALO), \
        "tile_l must be a multiple of 128 and >= round_up(2*padding, 128)"
    ntiles = -(-L // TL)
    L_pad = ntiles * TL

    # Body: right-pad x to a whole number of lane-dense tiles only when needed (tail columns are
    # causal-safe and discarded from the output).
    x_body = x if L_pad == L else jnp.pad(x, ((0, 0), (0, 0), (0, L_pad - L)))
    # Halo: last HALO columns of the previous tile (zeros for tile 0).  Reshape + tail slice +
    # small transpose — no full extra copy of x, no gather.
    tail = jnp.swapaxes(x_body.reshape(B, C_in, ntiles, TL)[:, :, :, TL - HALO:], 1, 2)
    x_halo = jnp.concatenate(
        [jnp.zeros((B, 1, C_in, HALO), x.dtype), tail[:, :ntiles - 1]], axis=1)

    # weight_norm, then split the taps along a leading axis so the kernel indexes them for free.
    w1t = jnp.transpose(_effective_weight(v1, g1), (2, 0, 1)).astype(mm_dtype)  # (K, C_out, C_in)
    w2t = jnp.transpose(_effective_weight(v2, g2), (2, 0, 1)).astype(mm_dtype)  # (K, C_out, C_out)
    b1c = b1.reshape(C_out, 1).astype(jnp.float32)
    b2c = b2.reshape(C_out, 1).astype(jnp.float32)

    kernel = functools.partial(temporal_block_kernel, K=K, dilation=dilation, padding=P,
                               halo=HALO, matmul_dtype=mm_dtype)

    flops = 2 * B * (L_pad + P) * K * C_out * (C_in + C_out)
    bytes_accessed = (x_body.size * x_body.dtype.itemsize
                      + x_halo.size * x_halo.dtype.itemsize
                      + B * C_out * L_pad * x.dtype.itemsize
                      + (w1t.size + w2t.size) * mm_dtype.itemsize
                      + (b1c.size + b2c.size) * 4)

    out = pl.pallas_call(
        kernel,
        out_shape=jax.ShapeDtypeStruct((B, C_out, L_pad), x.dtype),
        grid_spec=pltpu.PrefetchScalarGridSpec(
            num_scalar_prefetch=0,
            grid=(B, ntiles),
            in_specs=[
                pl.BlockSpec((None, C_in, TL), lambda b, j: (b, 0, j)),
                pl.BlockSpec((None, None, C_in, HALO), lambda b, j: (b, j, 0, 0)),
                pl.BlockSpec((K, C_out, C_in), lambda b, j: (0, 0, 0)),
                pl.BlockSpec((C_out, 1), lambda b, j: (0, 0)),
                pl.BlockSpec((K, C_out, C_out), lambda b, j: (0, 0, 0)),
                pl.BlockSpec((C_out, 1), lambda b, j: (0, 0)),
            ],
            out_specs=pl.BlockSpec((None, C_out, TL), lambda b, j: (b, 0, j)),
            scratch_shapes=[
                pltpu.VMEM((C_in, HALO + TL), mm_dtype),
                pltpu.VMEM((C_out, TL + P), mm_dtype),
            ],
        ),
        compiler_params=pltpu.CompilerParams(
            dimension_semantics=("parallel", "parallel"),
            vmem_limit_bytes=int((cap_bytes * 7) // 8)),
        cost_estimate=pl.CostEstimate(flops=int(flops), transcendentals=0,
                                      bytes_accessed=int(bytes_accessed)),
    )(x_body, x_halo, w1t, b1c, w2t, b2c)

    return out if L_pad == L else out[:, :, :L]


def temporal_block_ref(x, v1, g1, b1, v2, g2, b2, *, dilation, padding):
    """Pure-JAX reference mirroring the PyTorch forward (conv -> chomp -> relu, x2, residual relu)."""
    w1 = _effective_weight(v1, g1)
    w2 = _effective_weight(v2, g2)

    def conv_chomp_relu(h, w, b):
        y = jax.lax.conv_general_dilated(
            h, w, window_strides=(1,), padding=[(padding, padding)],
            rhs_dilation=(dilation,), dimension_numbers=("NCH", "OIH", "NCH"))
        y = y[:, :, :-padding]                                  # Chomp1d
        return jnp.maximum(y + b[None, :, None], 0.0)

    h1 = conv_chomp_relu(x, w1, b1)
    h2 = conv_chomp_relu(h1, w2, b2)
    return jnp.maximum(h2 + x, 0.0)


if __name__ == "__main__":
    B, C, L = 2, 32, 384
    K, stride, dilation = 3, 1, 2
    padding = (K - 1) * dilation

    key = jax.random.PRNGKey(0)
    kx, kv1, kg1, kb1, kv2, kg2, kb2 = jax.random.split(key, 7)

    x = jax.random.normal(kx, (B, C, L), dtype=jnp.float32)
    # conv weight_v ~ N(0, 0.01) as in init_weights; weight_g positive; bias small
    v1 = 0.01 * jax.random.normal(kv1, (C, C, K), dtype=jnp.float32)
    g1 = jax.random.uniform(kg1, (C, 1, 1), minval=0.5, maxval=1.5, dtype=jnp.float32)
    b1 = 0.1 * jax.random.normal(kb1, (C,), dtype=jnp.float32)
    v2 = 0.01 * jax.random.normal(kv2, (C, C, K), dtype=jnp.float32)
    g2 = jax.random.uniform(kg2, (C, 1, 1), minval=0.5, maxval=1.5, dtype=jnp.float32)
    b2 = 0.1 * jax.random.normal(kb2, (C,), dtype=jnp.float32)

    ref = temporal_block_ref(x, v1, g1, b1, v2, g2, b2, dilation=dilation, padding=padding)

    # 1) auto-picked tile (single tile per batch at this size)
    out = temporal_block(x, v1, g1, b1, v2, g2, b2,
                         kernel_size=K, stride=stride, dilation=dilation, padding=padding)
    out = jax.block_until_ready(out)
    assert out.shape == (B, C, L)
    # bf16 matmul operands (f32 accumulation) -> relaxed tolerance vs the pure-f32 reference
    assert jnp.allclose(out, ref, atol=2e-2, rtol=2e-2), "mismatch vs reference (auto tile)"

    # 2) forced multi-tile run to exercise the cross-tile halo path
    out_t = temporal_block(x, v1, g1, b1, v2, g2, b2,
                           kernel_size=K, stride=stride, dilation=dilation, padding=padding,
                           tile_l=128)
    out_t = jax.block_until_ready(out_t)
    assert jnp.allclose(out_t, ref, atol=2e-2, rtol=2e-2), "mismatch vs reference (tile_l=128)"

    print("KERNEL_OK")
</pallas_src>

<mosaic_0001>
module attributes {stable_mosaic.version = 11 : i64} {
  func.func @temporal_block_kernel(%arg0: i32, %arg1: i32, %arg2: memref<1x32x384xf32, #tpu.memory_space<vmem>>, %arg3: memref<1x1x32x128xf32, #tpu.memory_space<vmem>>, %arg4: memref<3x32x32xbf16, #tpu.memory_space<vmem>>, %arg5: memref<32x1xf32, #tpu.memory_space<vmem>>, %arg6: memref<3x32x32xbf16, #tpu.memory_space<vmem>>, %arg7: memref<32x1xf32, #tpu.memory_space<vmem>>, %arg8: memref<1x32x384xf32, #tpu.memory_space<vmem>>, %arg9: memref<32x512xbf16, #tpu.memory_space<vmem>>, %arg10: memref<32x388xbf16, #tpu.memory_space<vmem>>) attributes {dimension_semantics = [#tpu.dimension_semantics<parallel>, #tpu.dimension_semantics<parallel>], iteration_bounds = array<i64: 2, 1>, scalar_prefetch = 0 : i64, scratch_operands = 2 : i64, tpu.core_type = #tpu.core_type<tc>, window_params = [{transform_indices = @transform_0, window_bounds = array<i64: 1, 32, 384>}, {transform_indices = @transform_1, window_bounds = array<i64: 1, 1, 32, 128>}, {pipeline_mode = #tpu.pipeline_mode<synchronous>, transform_indices = @transform_2, window_bounds = array<i64: 3, 32, 32>}, {pipeline_mode = #tpu.pipeline_mode<synchronous>, transform_indices = @transform_3, window_bounds = array<i64: 32, 1>}, {pipeline_mode = #tpu.pipeline_mode<synchronous>, transform_indices = @transform_4, window_bounds = array<i64: 3, 32, 32>}, {pipeline_mode = #tpu.pipeline_mode<synchronous>, transform_indices = @transform_5, window_bounds = array<i64: 32, 1>}, {transform_indices = @transform_6, window_bounds = array<i64: 1, 32, 384>}]} {
    %c0 = arith.constant 0 : index
    %c0_0 = arith.constant 0 : index
    %c0_1 = arith.constant 0 : index
    %c0_2 = arith.constant 0 : index
    %0 = vector.load %arg3[%c0, %c0_0, %c0_1, %c0_2] : memref<1x1x32x128xf32, #tpu.memory_space<vmem>>, vector<1x1x32x128xf32>
    %1 = vector.shape_cast %0 : vector<1x1x32x128xf32> to vector<32x128xf32>
    %2 = arith.truncf %1 : vector<32x128xf32> to vector<32x128xbf16>
    %c0_3 = arith.constant 0 : index
    %c0_4 = arith.constant 0 : index
    %3 = vector.load %arg9[%c0_3, %c0_4] : memref<32x512xbf16, #tpu.memory_space<vmem>>, vector<32x128xbf16>
    tpu.vector_store %arg9[%c0_3, %c0_4], %2 {strides = array<i32>} : memref<32x512xbf16, #tpu.memory_space<vmem>>, vector<32x128xbf16>,
    %c0_5 = arith.constant 0 : index
    %c0_6 = arith.constant 0 : index
    %c0_7 = arith.constant 0 : index
    %4 = vector.load %arg2[%c0_5, %c0_6, %c0_7] : memref<1x32x384xf32, #tpu.memory_space<vmem>>, vector<1x32x384xf32>
    %5 = vector.shape_cast %4 : vector<1x32x384xf32> to vector<32x384xf32>
    %6 = arith.truncf %5 : vector<32x384xf32> to vector<32x384xbf16>
    %c0_8 = arith.constant 0 : index
    %c128 = arith.constant 128 : index
    %7 = vector.load %arg9[%c0_8, %c128] : memref<32x512xbf16, #tpu.memory_space<vmem>>, vector<32x384xbf16>
    tpu.vector_store %arg9[%c0_8, %c128], %6 {strides = array<i32>} : memref<32x512xbf16, #tpu.memory_space<vmem>>, vector<32x384xbf16>,
    %c0_9 = arith.constant 0 : index
    %c0_10 = arith.constant 0 : index
    %c0_11 = arith.constant 0 : index
    %8 = vector.load %arg4[%c0_9, %c0_10, %c0_11] : memref<3x32x32xbf16, #tpu.memory_space<vmem>>, vector<1x32x32xbf16>
    %9 = vector.shape_cast %8 : vector<1x32x32xbf16> to vector<32x32xbf16>
    %c0_12 = arith.constant 0 : index
    %c120 = arith.constant 120 : index
    %10 = vector.load %arg9[%c0_12, %c120] : memref<32x512xbf16, #tpu.memory_space<vmem>>, vector<32x388xbf16>
    %cst = arith.constant dense<0.000000e+00> : vector<32x388xf32>
    %11 = tpu.matmul %9, %10, %cst {dimension_numbers = #tpu.dot_dimension_numbers<[1], [0], [0], [1], [0, 0, 1, 1], [], []>} : vector<32x32xbf16>, vector<32x388xbf16>, vector<32x388xf32> -> vector<32x388xf32>
    %c1 = arith.constant 1 : index
    %c0_13 = arith.constant 0 : index
    %c0_14 = arith.constant 0 : index
    %12 = vector.load %arg4[%c1, %c0_13, %c0_14] : memref<3x32x32xbf16, #tpu.memory_space<vmem>>, vector<1x32x32xbf16>
    %13 = vector.shape_cast %12 : vector<1x32x32xbf16> to vector<32x32xbf16>
    %c0_15 = arith.constant 0 : index
    %c122 = arith.constant 122 : index
    %14 = vector.load %arg9[%c0_15, %c122] : memref<32x512xbf16, #tpu.memory_space<vmem>>, vector<32x388xbf16>
    %cst_16 = arith.constant dense<0.000000e+00> : vector<32x388xf32>
    %15 = tpu.matmul %13, %14, %cst_16 {dimension_numbers = #tpu.dot_dimension_numbers<[1], [0], [0], [1], [0, 0, 1, 1], [], []>} : vector<32x32xbf16>, vector<32x388xbf16>, vector<32x388xf32> -> vector<32x388xf32>
    %16 = arith.addf %11, %15 : vector<32x388xf32>
    %c2 = arith.constant 2 : index
    %c0_17 = arith.constant 0 : index
    %c0_18 = arith.constant 0 : index
    %17 = vector.load %arg4[%c2, %c0_17, %c0_18] : memref<3x32x32xbf16, #tpu.memory_space<vmem>>, vector<1x32x32xbf16>
    %18 = vector.shape_cast %17 : vector<1x32x32xbf16> to vector<32x32xbf16>
    %c0_19 = arith.constant 0 : index
    %c124 = arith.constant 124 : index
    %19 = vector.load %arg9[%c0_19, %c124] : memref<32x512xbf16, #tpu.memory_space<vmem>>, vector<32x388xbf16>
    %cst_20 = arith.constant dense<0.000000e+00> : vector<32x388xf32>
    %20 = tpu.matmul %18, %19, %cst_20 {dimension_numbers = #tpu.dot_dimension_numbers<[1], [0], [0], [1], [0, 0, 1, 1], [], []>} : vector<32x32xbf16>, vector<32x388xbf16>, vector<32x388xf32> -> vector<32x388xf32>
    %21 = arith.addf %16, %20 : vector<32x388xf32>
    %c0_21 = arith.constant 0 : index
    %c0_22 = arith.constant 0 : index
    %22 = vector.load %arg5[%c0_21, %c0_22] : memref<32x1xf32, #tpu.memory_space<vmem>>, vector<32x1xf32>
    %23 = vector.broadcast %22 : vector<32x1xf32> to vector<32x388xf32>
    %24 = arith.addf %21, %23 : vector<32x388xf32>
    %cst_23 = arith.constant 0.000000e+00 : f32
    %25 = vector.broadcast %cst_23 : f32 to vector<32x388xf32>
    %26 = arith.maximumf %24, %25 : vector<32x388xf32>
    %27 = arith.truncf %26 : vector<32x388xf32> to vector<32x388xbf16>
    %c0_24 = arith.constant 0 : index
    %c0_25 = arith.constant 0 : index
    %28 = vector.load %arg10[%c0_24, %c0_25] : memref<32x388xbf16, #tpu.memory_space<vmem>>, vector<32x388xbf16>
    tpu.vector_store %arg10[%c0_24, %c0_25], %27 {strides = array<i32>} : memref<32x388xbf16, #tpu.memory_space<vmem>>, vector<32x388xbf16>,
    %c0_i32 = arith.constant 0 : i32
    %29 = arith.cmpi eq, %arg1, %c0_i32 : i32
    %30 = arith.extui %29 : i1 to i32
    %c0_i32_26 = arith.constant 0 : i32
    %31 = arith.cmpi ne, %30, %c0_i32_26 : i32
    scf.if %31 {
      %cst_54 = arith.constant 0.000000e+00 : bf16
      %59 = vector.broadcast %cst_54 : bf16 to vector<32x4xbf16>
      %c0_55 = arith.constant 0 : index
      %c0_56 = arith.constant 0 : index
      %60 = vector.load %arg10[%c0_55, %c0_56] : memref<32x388xbf16, #tpu.memory_space<vmem>>, vector<32x4xbf16>
      tpu.vector_store %arg10[%c0_55, %c0_56], %59 {strides = array<i32>} : memref<32x388xbf16, #tpu.memory_space<vmem>>, vector<32x4xbf16>,
    } else {
    }
    %c0_27 = arith.constant 0 : index
    %c0_28 = arith.constant 0 : index
    %c0_29 = arith.constant 0 : index
    %32 = vector.load %arg6[%c0_27, %c0_28, %c0_29] : memref<3x32x32xbf16, #tpu.memory_space<vmem>>, vector<1x32x32xbf16>
    %33 = vector.shape_cast %32 : vector<1x32x32xbf16> to vector<32x32xbf16>
    %c0_30 = arith.constant 0 : index
    %c0_31 = arith.constant 0 : index
    %34 = vector.load %arg10[%c0_30, %c0_31] : memref<32x388xbf16, #tpu.memory_space<vmem>>, vector<32x384xbf16>
    %cst_32 = arith.constant dense<0.000000e+00> : vector<32x384xf32>
    %35 = tpu.matmul %33, %34, %cst_32 {dimension_numbers = #tpu.dot_dimension_numbers<[1], [0], [0], [1], [0, 0, 1, 1], [], []>} : vector<32x32xbf16>, vector<32x384xbf16>, vector<32x384xf32> -> vector<32x384xf32>
    %c1_33 = arith.constant 1 : index
    %c0_34 = arith.constant 0 : index
    %c0_35 = arith.constant 0 : index
    %36 = vector.load %arg6[%c1_33, %c0_34, %c0_35] : memref<3x32x32xbf16, #tpu.memory_space<vmem>>, vector<1x32x32xbf16>
    %37 = vector.shape_cast %36 : vector<1x32x32xbf16> to vector<32x32xbf16>
    %c0_36 = arith.constant 0 : index
    %c2_37 = arith.constant 2 : index
    %38 = vector.load %arg10[%c0_36, %c2_37] : memref<32x388xbf16, #tpu.memory_space<vmem>>, vector<32x384xbf16>
    %cst_38 = arith.constant dense<0.000000e+00> : vector<32x384xf32>
    %39 = tpu.matmul %37, %38, %cst_38 {dimension_numbers = #tpu.dot_dimension_numbers<[1], [0], [0], [1], [0, 0, 1, 1], [], []>} : vector<32x32xbf16>, vector<32x384xbf16>, vector<32x384xf32> -> vector<32x384xf32>
    %40 = arith.addf %35, %39 : vector<32x384xf32>
    %c2_39 = arith.constant 2 : index
    %c0_40 = arith.constant 0 : index
    %c0_41 = arith.constant 0 : index
    %41 = vector.load %arg6[%c2_39, %c0_40, %c0_41] : memref<3x32x32xbf16, #tpu.memory_space<vmem>>, vector<1x32x32xbf16>
    %42 = vector.shape_cast %41 : vector<1x32x32xbf16> to vector<32x32xbf16>
    %c0_42 = arith.constant 0 : index
    %c4 = arith.constant 4 : index
    %43 = vector.load %arg10[%c0_42, %c4] : memref<32x388xbf16, #tpu.memory_space<vmem>>, vector<32x384xbf16>
    %cst_43 = arith.constant dense<0.000000e+00> : vector<32x384xf32>
    %44 = tpu.matmul %42, %43, %cst_43 {dimension_numbers = #tpu.dot_dimension_numbers<[1], [0], [0], [1], [0, 0, 1, 1], [], []>} : vector<32x32xbf16>, vector<32x384xbf16>, vector<32x384xf32> -> vector<32x384xf32>
    %45 = arith.addf %40, %44 : vector<32x384xf32>
    %c0_44 = arith.constant 0 : index
    %c0_45 = arith.constant 0 : index
    %46 = vector.load %arg7[%c0_44, %c0_45] : memref<32x1xf32, #tpu.memory_space<vmem>>, vector<32x1xf32>
    %47 = vector.broadcast %46 : vector<32x1xf32> to vector<32x384xf32>
    %48 = arith.addf %45, %47 : vector<32x384xf32>
    %cst_46 = arith.constant 0.000000e+00 : f32
    %49 = vector.broadcast %cst_46 : f32 to vector<32x384xf32>
    %50 = arith.maximumf %48, %49 : vector<32x384xf32>
    %c0_47 = arith.constant 0 : index
    %c0_48 = arith.constant 0 : index
    %c0_49 = arith.constant 0 : index
    %51 = vector.load %arg2[%c0_47, %c0_48, %c0_49] : memref<1x32x384xf32, #tpu.memory_space<vmem>>, vector<1x32x384xf32>
    %52 = vector.shape_cast %51 : vector<1x32x384xf32> to vector<32x384xf32>
    %53 = arith.addf %50, %52 : vector<32x384xf32>
    %cst_50 = arith.constant 0.000000e+00 : f32
    %54 = vector.broadcast %cst_50 : f32 to vector<32x384xf32>
    %55 = arith.maximumf %53, %54 : vector<32x384xf32>
    %c0_51 = arith.constant 0 : index
    %c0_52 = arith.constant 0 : index
    %c0_53 = arith.constant 0 : index
    %56 = vector.load %arg8[%c0_51, %c0_52, %c0_53] : memref<1x32x384xf32, #tpu.memory_space<vmem>>, vector<1x32x384xf32>
    %57 = vector.shape_cast %56 : vector<1x32x384xf32> to vector<32x384xf32>
    %58 = vector.shape_cast %55 : vector<32x384xf32> to vector<1x32x384xf32>
    tpu.vector_store %arg8[%c0_51, %c0_52, %c0_53], %58 {strides = array<i32>} : memref<1x32x384xf32, #tpu.memory_space<vmem>>, vector<1x32x384xf32>,
    return
  }
  func.func @transform_0(%arg0: i32, %arg1: i32) -> (i32, i32, i32) {
    %c0_i32 = arith.constant 0 : i32
    %c0_i32_0 = arith.constant 0 : i32
    return %arg0, %c0_i32, %arg1 : i32, i32, i32
  }
  func.func @transform_1(%arg0: i32, %arg1: i32) -> (i32, i32, i32, i32) {
    %c0_i32 = arith.constant 0 : i32
    %c0_i32_0 = arith.constant 0 : i32
    %c0_i32_1 = arith.constant 0 : i32
    return %arg0, %arg1, %c0_i32, %c0_i32_0 : i32, i32, i32, i32
  }
  func.func @transform_2(%arg0: i32, %arg1: i32) -> (i32, i32, i32) {
    %c0_i32 = arith.constant 0 : i32
    %c0_i32_0 = arith.constant 0 : i32
    %c0_i32_1 = arith.constant 0 : i32
    %c0_i32_2 = arith.constant 0 : i32
    return %c0_i32, %c0_i32_0, %c0_i32_1 : i32, i32, i32
  }
  func.func @transform_3(%arg0: i32, %arg1: i32) -> (i32, i32) {
    %c0_i32 = arith.constant 0 : i32
    %c0_i32_0 = arith.constant 0 : i32
    %c0_i32_1 = arith.constant 0 : i32
    return %c0_i32, %c0_i32_0 : i32, i32
  }
  func.func @transform_4(%arg0: i32, %arg1: i32) -> (i32, i32, i32) {
    %c0_i32 = arith.constant 0 : i32
    %c0_i32_0 = arith.constant 0 : i32
    %c0_i32_1 = arith.constant 0 : i32
    %c0_i32_2 = arith.constant 0 : i32
    return %c0_i32, %c0_i32_0, %c0_i32_1 : i32, i32, i32
  }
  func.func @transform_5(%arg0: i32, %arg1: i32) -> (i32, i32) {
    %c0_i32 = arith.constant 0 : i32
    %c0_i32_0 = arith.constant 0 : i32
    %c0_i32_1 = arith.constant 0 : i32
    return %c0_i32, %c0_i32_0 : i32, i32
  }
  func.func @transform_6(%arg0: i32, %arg1: i32) -> (i32, i32, i32) {
    %c0_i32 = arith.constant 0 : i32
    %c0_i32_0 = arith.constant 0 : i32
    return %arg0, %c0_i32, %arg1 : i32, i32, i32
  }
}

</mosaic_0001>

<bundles_post_ra>
// kernel: tpu_custom_call.1
= control target key start
LH: loop header
LB: loop body
LE: loop exit
PB: predicated region body
PF: predicated region fallthrough
CT: control target
= control target key end

     0   :  { %s2901_s0 = inlined_call_operand.hbm [shape: f32[2,32,384], index: 0, kind: input, shape index: {}]   ;;  %s2902_s1 = inlined_call_operand.hbm [shape: f32[2,1,32,128], index: 1, kind: input, shape index: {}]   ;;  %s2903_s2 = inlined_call_operand.hbm [shape: bf16[3,32,32], index: 2, kind: input, shape index: {}]   ;;  %s2904_s3 = inlined_call_operand.hbm [shape: f32[32,1], index: 3, kind: input, shape index: {}]   ;;  %s2905_s4 = inlined_call_operand.hbm [shape: bf16[3,32,32], index: 4, kind: input, shape index: {}]   ;;  %s2906_s5 = inlined_call_operand.hbm [shape: f32[32,1], index: 5, kind: input, shape index: {}]   ;;  %s2907_s6 = inlined_call_operand.hbm [shape: f32[2,32,384], index: 6, kind: output, shape index: {}]  }
   0x1   :  { %2918 = sst [smem:[#allocation24_spill]] %s2901_s0 }
   0x2   :  { %2919 = sst [smem:[#allocation25_spill]] %s2903_s2 }
   0x3   :  { %2920 = sst [smem:[#allocation26_spill]] %s2904_s3 }
   0x4   :  { %2921 = sst [smem:[#allocation27_spill]] %s2905_s4 }
   0x5   :  { %2922 = sst [smem:[#allocation28_spill]] %s2906_s5 }
   0x6   :  { %11 = vsyncpa [#allocation5], 0 }
   0x7   :  { %13 = vsyncpa [#allocation5 + $0x1], 0 }
   0x8   :  { %14 = vsyncpa [#allocation8], 0 }
   0x9   :  { %16 = vsyncpa [#allocation8 + $0x1], 0 }
   0xa   :  { %17 = vsyncpa [#allocation11], 0 }
   0xb   :  { %18 = vsyncpa [#allocation14], 0 }
   0xc   :  { %19 = vsyncpa [#allocation6], 0 }
   0xd   :  { %21 = vsyncpa [#allocation6 + $0x1], 0  ;;  %s2345_s21 = smov 0   ;;  %s2347_s22 = smov 0  }
   0xe   :  { %s2349_s23 = smov 0   ;;  %s2351_s24 = smov 0  }
   0xf   :  { %s2353_s25 = smov 0   ;;  %s2355_s26 = smov 0  }
  0x10 LB: > { %s2376_s27 = sadd.s32 4294967295, %s2287_s26   ;;  %s1728_s28 = sadd.s32 4294967294, %s2287_s26   ;;  %s2287_s26 = sphi %s2355_s26, %s27_s26   ;;  %s2283_s25 = sphi %s2353_s25, %s2958_s25   ;;  %s2279_s24 = sphi %s2351_s24, %s2957_s24   ;;  %s2275_s23 = sphi %s2349_s23, %s2956_s23   ;;  %s2271_s22 = sphi %s2347_s22, %s2955_s22   ;;  %s2267_s21 = sphi %s2345_s21, %s2954_s21  }
  0x11   : > { %p61_p0 = scmp.ne.s32.totalorder %s2271_s22, %s2267_s21  ;;  %p2908_p1 = scmp.eq.s32.totalorder %s2376_s27, 0 }
  0x12   : > { %p205_p3 = scmp.eq.s32.totalorder %s1728_s28, 1  ;;  %p1729_p5 = scmp.ge.s32.totalorder %s2287_s26, 1 }
  0x13   : > { %p2385_p4 = por %p2908_p1, %p61_p0  ;;  %p212_p7 = scmp.lt.s32.totalorder %s2287_s26, 3 }
  0x14   : > { %p2390_p6 = por %p205_p3, %p61_p0  ;;  %s2289_s8 = smov [#allocation9]  }
  0x15   : > { %s2923_s29 = scalar_select %p2385_p4, 1, 0 }
  0x16   : > { %s2924_s30 = scalar_select %p2390_p6, 1, 0 }
  0x17   : > { %p2395_p8 = pnand %p1729_p5, %p212_p7  ;;  %s224_s9 = sshll.u32 %s2289_s8, 4  ;;  %s2399_s9 = int_to_ptr.vmem [resolvable:$true] %s224_s9 }
  0x18   : > { %2925 = sst [smem:[#allocation22_spill]] %s2924_s30  ;;  %s2290_s11 = smov [#allocation10]  }
  0x19   : > { %s2926_s7 = scalar_select %p2395_p8, 1, 0 }
  0x1a   : > { %p1903_p9 = pneg %p2395_p8  ;;  %s237_s12 = sshll.u32 %s2290_s11, 4  ;;  %s2410_s12 = int_to_ptr.vmem [resolvable:$true] %s237_s12 }
  0x1b   : > { %s2928_s2 = sld [smem:[#allocation25_spill]] }
  0x1c   : > { %p2406_p11 = pnand %p1903_p9, %p2908_p1 }
  0x1e   : > { %p2420_p13 = pneg %p2406_p11 }
  0x21   : > { %s2017_s15 = scalar_lea.hbm %s2928_s2, 768 }
  0x22   : > { %p2018_p12 = scmp.ne.s32.totalorder %s2928_s2, %s2017_s15  ;;  %p2024_p5 = scmp.lt.u32.totalorder %s2017_s15, %s2928_s2 }
  0x24   : > { %p2020_p0 = pnand %p2420_p13, %p2018_p12 }
  0x26   : > { %p2021_p3 = pneg %p2020_p0 }
  0x28   : > { %p2026_p7 = pnand %p2024_p5, %p2021_p3 }
  0x2a   : > { %2029 = shalt.err (!%p2026_p7)
}
  0x2b   : > { %s2030_s28 = scalar_lea.vmem %s2399_s9, 768  ;;  %p2038_p2 = scmp.lt.s32.totalorder %s2399_s9, %s2399_s9 }
  0x2c   : > { %p2031_p9 = scmp.ne.s32.totalorder %s2399_s9, %s2030_s28  ;;  %p2039_p6 = scmp.lt.s32.totalorder %s2030_s28, %s2030_s28 }
  0x2e   : > { %p2033_p10 = pnand %p2031_p9, %p2420_p13  ;;  %p2040_p12 = por %p2039_p6, %p2038_p2 }
  0x30   : > { %p2034_p1 = pneg %p2033_p10 }
  0x32   : > { %p2041_p0 = pnand %p2040_p12, %p2034_p1 }
  0x34   : > { %2044 = shalt.err (!%p2041_p0)
}
  0x35   : > { %s2910_s8 = smov 64   ;;  %s2911_s11 = smov 4  }
  0x36   : > { %1906 = dma.hbm_to_vmem [thread:$0]  (!%p2406_p11), %s2928_s2, 768, %s2399_s9, [#allocation8], %s2910_s8, %s2910_s8, %s2911_s11  }
  0x37   : > { %s2930_s3 = sld [smem:[#allocation26_spill]] }
  0x3d   : > { %s2045_s17 = scalar_lea.hbm %s2930_s3, 512 }
  0x3e   : > { %p2046_p1 = scmp.ne.s32.totalorder %s2930_s3, %s2045_s17  ;;  %p2052_p10 = scmp.lt.u32.totalorder %s2045_s17, %s2930_s3 }
  0x40   : > { %p2048_p2 = pnand %p2046_p1, %p2420_p13 }
  0x42   : > { %p2049_p6 = pneg %p2048_p2 }
  0x44   : > { %p2054_p3 = pnand %p2052_p10, %p2049_p6 }
  0x46   : > { %2057 = shalt.err (!%p2054_p3)
}
  0x47   : > { %s2058_s9 = scalar_lea.vmem %s2410_s12, 512  ;;  %p2066_p12 = scmp.lt.s32.totalorder %s2410_s12, %s2410_s12 }
  0x48   : > { %p2059_p5 = scmp.ne.s32.totalorder %s2410_s12, %s2058_s9  ;;  %p2067_p0 = scmp.lt.s32.totalorder %s2058_s9, %s2058_s9 }
  0x4a   : > { %p2061_p7 = pnand %p2059_p5, %p2420_p13  ;;  %p2068_p1 = por %p2067_p0, %p2066_p12 }
  0x4c   : > { %p2062_p9 = pneg %p2061_p7 }
  0x4e   : > { %p2069_p2 = pnand %p2068_p1, %p2062_p9 }
  0x50   : > { %2072 = shalt.err (!%p2069_p2)
}
  0x51   : > { %s2914_s13 = smov 128   ;;  %s2916_s30 = smov 8  }
  0x52   : > { %1909 = dma.hbm_to_vmem [thread:$0]  (!%p2406_p11), %s2930_s3, 512, %s2410_s12, [#allocation11], %s2914_s13, %s2914_s13, %s2916_s30  }
  0x53   : > { %s2295_s16 = smov [#allocation12]   ;;  %s2296_s19 = smov [#allocation13]  }
  0x54   : > { %s250_s17 = sshll.u32 %s2295_s16, 4  ;;  %s263_s20 = sshll.u32 %s2296_s19, 4  ;;  %s251_s17 = int_to_ptr.vmem [resolvable:$true] %s250_s17  ;;  %s2470_s20 = int_to_ptr.vmem [resolvable:$true] %s263_s20 }
  0x55   : > { %s2931_s4 = sld [smem:[#allocation27_spill]] }
  0x5b   : > { %s2073_s8 = scalar_lea.hbm %s2931_s4, 768 }
  0x5c   : > { %p2074_p6 = scmp.ne.s32.totalorder %s2931_s4, %s2073_s8  ;;  %p2080_p5 = scmp.lt.u32.totalorder %s2073_s8, %s2931_s4 }
  0x5e   : > { %p2076_p10 = pnand %p2074_p6, %p2420_p13 }
  0x60   : > { %p2077_p3 = pneg %p2076_p10 }
  0x62   : > { %p2082_p7 = pnand %p2080_p5, %p2077_p3 }
  0x64   : > { %2085 = shalt.err (!%p2082_p7)
}
  0x65   : > { %s2086_s15 = scalar_lea.vmem %s251_s17, 768  ;;  %p2094_p1 = scmp.lt.s32.totalorder %s251_s17, %s251_s17 }
  0x66   : > { %p2087_p9 = scmp.ne.s32.totalorder %s251_s17, %s2086_s15  ;;  %p2095_p2 = scmp.lt.s32.totalorder %s2086_s15, %s2086_s15 }
  0x68   : > { %p2089_p12 = pnand %p2087_p9, %p2420_p13  ;;  %p2096_p4 = por %p2095_p2, %p2094_p1 }
  0x6a   : > { %p2090_p0 = pneg %p2089_p12 }
  0x6c   : > { %p2097_p8 = pnand %p2096_p4, %p2090_p0 }
  0x6e   : > { %2100 = shalt.err (!%p2097_p8)
}
  0x6f   : > { %s2932_s2 = smov 4   ;;  %s2933_s11 = smov 64  }
  0x70   : > { %1912 = dma.hbm_to_vmem [thread:$0]  (!%p2406_p11), %s2931_s4, 768, %s251_s17, [#allocation11], %s2933_s11, %s2933_s11, %s2932_s2  }
  0x71   : > { %s2934_s5 = sld [smem:[#allocation28_spill]] }
  0x77   : > { %s2101_s9 = scalar_lea.hbm %s2934_s5, 512 }
  0x78   : > { %p2102_p6 = scmp.ne.s32.totalorder %s2934_s5, %s2101_s9  ;;  %p2108_p10 = scmp.lt.u32.totalorder %s2101_s9, %s2934_s5 }
  0x7a   : > { %p2104_p4 = pnand %p2102_p6, %p2420_p13 }
  0x7c   : > { %p2105_p8 = pneg %p2104_p4 }
  0x7e   : > { %p2110_p3 = pnand %p2108_p10, %p2105_p8 }
  0x80   : > { %2113 = shalt.err (!%p2110_p3)
}
  0x81   : > { %s2114_s17 = scalar_lea.vmem %s2470_s20, 512  ;;  %p2122_p12 = scmp.lt.s32.totalorder %s2470_s20, %s2470_s20 }
  0x82   : > { %p2115_p5 = scmp.ne.s32.totalorder %s2470_s20, %s2114_s17  ;;  %p2123_p0 = scmp.lt.s32.totalorder %s2114_s17, %s2114_s17 }
  0x84   : > { %p2117_p7 = pnand %p2115_p5, %p2420_p13  ;;  %p2124_p1 = por %p2123_p0, %p2122_p12 }
  0x86   : > { %p2118_p9 = pneg %p2117_p7 }
  0x88   : > { %p2125_p2 = pnand %p2124_p1, %p2118_p9 }
  0x8a   : > { %2128 = shalt.err (!%p2125_p2)
}
  0x8b   : > { %s2935_s13 = smov 128   ;;  %s39_s10 = sadd.s32 1, %s2283_s25 }
  0x8c   : > { %1915 = dma.hbm_to_vmem [thread:$0]  (!%p2406_p11), %s2934_s5, 512, %s2470_s20, [#allocation14], %s2935_s13, %s2935_s13, %s2916_s30  }
  0x8d   : > { %s48_s18 = sadd.s32 1, %s2275_s23  ;;  %p41_p13 = scmp.ge.s32.totalorder %s39_s10, 2 }
  0x8e   : > { %p55_p6 = scmp.ne.s32.totalorder %s2275_s23, %s2271_s22  ;;  %p56_p4 = scmp.eq.s32.totalorder %s2287_s26, 0 }
  0x8f   : > { %p1931_p8 = scmp.lt.s32.totalorder %s2287_s26, 2  ;;  %s2960_s10 = smov (%p41_p13, %s39_s10), 0 }
  0x90   : > { %2936 = sst [smem:[#allocation23_spill]] %s2960_s10  ;;  %p57_p10 = por %p56_p4, %p55_p6 }
  0x91   : > { %p2937_p3 = scmp.eq.s32.totalorder %s2376_s27, 1  ;;  %s43_s8 = ssub.s32 %s2283_s25, %s2960_s10 }
  0x92   : > { %s2536_s19 = sand.u32 1, %s2275_s23   ;;  %p46_p11 = scmp.eq.s32.totalorder %s43_s8, 0 }
  0x93   : > { %p2529_p5 = por %p2937_p3, %p55_p6  ;;  %s1877_s20 = smul.u32 96, %s2536_s19 }
  0x94   : > { %p2539_p7 = pnand %p1931_p8, %p57_p10  ;;  %s1878_s14 = smul.u32 1536, %s2283_s25 }
  0x95   : > { %s2544_s9 = scalar_select %p46_p11, %s2275_s23, %s48_s18  }
  0x96   : > { %s281_s12 = scalar_lea.vmem [#allocation4], %s1877_s20  ;;  %s2940_s0 = sld [smem:[#allocation24_spill]] }
  0x97   : > { %s290_s15 = sshll.u32 %s281_s12, 4  ;;  %s278_s8 = scalar_lea.sflag [#allocation5], %s2536_s19  ;;  %s2552_s15 = int_to_ptr.vmem [resolvable:$true] %s290_s15 }
  0x98   : > { %p2131_p12 = pneg %p2539_p7 }
  0x9c   : > { %s2550_s11 = scalar_lea.hbm %s2940_s0, %s1878_s14  ;;  %s2134_s14 = scalar_lea.hbm %s2940_s0, 3072 }
  0x9d   : > { %s2129_s30 = scalar_lea.hbm %s2550_s11, 1536  ;;  %p2135_p2 = scmp.lt.u32.totalorder %s2550_s11, %s2940_s0 }
  0x9e   : > { %p2130_p9 = scmp.ne.s32.totalorder %s2550_s11, %s2129_s30  ;;  %p2136_p13 = scmp.lt.u32.totalorder %s2134_s14, %s2129_s30 }
  0x9f   : > { %p2138_p4 = scmp.lt.u32.totalorder %s2129_s30, %s2550_s11 }
  0xa0   : > { %p2132_p0 = pnand %p2131_p12, %p2130_p9  ;;  %p2137_p6 = por %p2136_p13, %p2135_p2 }
  0xa2   : > { %p2133_p1 = pneg %p2132_p0  ;;  %p2139_p8 = por %p2138_p4, %p2137_p6 }
  0xa4   : > { %p2140_p10 = pnand %p2139_p8, %p2133_p1 }
  0xa6   : > { %2143 = shalt.err (!%p2140_p10)
}
  0xa7   : > { %s2144_s2 = scalar_lea.vmem %s2552_s15, 1536  ;;  %s2297_s18 = smov [#allocation4]  }
  0xa8   : > { %p2145_p3 = scmp.ne.s32.totalorder %s2552_s15, %s2144_s2  ;;  %s2149_s20 = sshll.u32 %s2297_s18, 4  ;;  %s2150_s20 = int_to_ptr.vmem [resolvable:$false] %s2149_s20 }
  0xa9   : > { %s2151_s12 = scalar_lea.vmem %s2150_s20, 3072  ;;  %p2152_p0 = scmp.lt.s32.totalorder %s2552_s15, %s2150_s20 }
  0xaa   : > { %p2147_p11 = pnand %p2145_p3, %p2131_p12  ;;  %p2153_p2 = scmp.lt.s32.totalorder %s2151_s12, %s2144_s2 }
  0xac   : > { %p2148_p9 = pneg %p2147_p11  ;;  %p2154_p13 = por %p2153_p2, %p2152_p0 }
  0xae   : > { %p2155_p6 = pnand %p2154_p13, %p2148_p9 }
  0xb0   : > { %2158 = shalt.err (!%p2155_p6)
}
  0xb1   : > { %s2298_s30 = smov 384   ;;  %s2299_s14 = smov 24  }
  0xb2   : > { %1919 = dma.hbm_to_vmem [thread:$0]  (!%p2539_p7), %s2550_s11, 1536, %s2552_s15, %s278_s8, %s2298_s30, %s2298_s30, %s2299_s14  }
  0xb3   : > { %s300_s17 = sand.u32 1, %s2287_s26   ;;  %s1736_s18 = sshll.u32 %s2536_s19, 5 }
  0xb4   : > { %s1784_s20 = sshll.u32 %s2283_s25, 9  ;;  %s304_s2 = scalar_lea.vmem [#allocation7], %s1736_s18 }
  0xb5   : > { %s313_s12 = sshll.u32 %s304_s2, 4  ;;  %s2588_s4 = scalar_lea.hbm %s2902_s1, %s1784_s20  ;;  %s2590_s12 = int_to_ptr.vmem [resolvable:$true] %s313_s12 }
  0xb6   : > { %s2592_s5 = scalar_lea.sflag [#allocation8], %s300_s17  ;;  %s2159_s10 = scalar_lea.hbm %s2588_s4, 512 }
  0xb7   : > { %p2160_p1 = scmp.ne.s32.totalorder %s2588_s4, %s2159_s10  ;;  %s2164_s0 = scalar_lea.hbm %s2902_s1, 1024 }
  0xb8   : > { %p2165_p10 = scmp.lt.u32.totalorder %s2588_s4, %s2902_s1  ;;  %p2166_p3 = scmp.lt.u32.totalorder %s2164_s0, %s2159_s10 }
  0xb9   : > { %p2162_p4 = pnand %p2160_p1, %p2131_p12  ;;  %p2168_p9 = scmp.lt.u32.totalorder %s2159_s10, %s2588_s4 }
  0xba   : > { %p2167_p11 = por %p2166_p3, %p2165_p10 }
  0xbb   : > { %p2163_p8 = pneg %p2162_p4 }
  0xbc   : > { %p2169_p0 = por %p2168_p9, %p2167_p11 }
  0xbe   : > { %p2170_p2 = pnand %p2169_p0, %p2163_p8 }
  0xc0   : > { %2173 = shalt.err (!%p2170_p2)
}
  0xc1   : > { %s2174_s8 = scalar_lea.vmem %s2590_s12, 512  ;;  %s2300_s30 = smov [#allocation7]  }
  0xc2   : > { %p2175_p13 = scmp.ne.s32.totalorder %s2590_s12, %s2174_s8  ;;  %s2179_s14 = sshll.u32 %s2300_s30, 4  ;;  %s2180_s14 = int_to_ptr.vmem [resolvable:$false] %s2179_s14 }
  0xc3   : > { %s2181_s17 = scalar_lea.vmem %s2180_s14, 1024  ;;  %p2182_p4 = scmp.lt.s32.totalorder %s2590_s12, %s2180_s14 }
  0xc4   : > { %p2177_p6 = pnand %p2175_p13, %p2131_p12  ;;  %p2183_p10 = scmp.lt.s32.totalorder %s2181_s17, %s2174_s8 }
  0xc6   : > { %p2178_p1 = pneg %p2177_p6  ;;  %p2184_p3 = por %p2183_p10, %p2182_p4 }
  0xc8   : > { %p2185_p11 = pnand %p2184_p3, %p2178_p1 }
  0xca   : > { %2188 = shalt.err (!%p2185_p11)
}
  0xcb   : > { %s2941_s10 = smov 8   ;;  %p2942_p12 = scmp.ne.s32.totalorder %s2926_s7, 0 }
  0xcc   : > { %1922 = dma.hbm_to_vmem [thread:$0]  (!%p2539_p7), %s2588_s4, 512, %s2590_s12, %s2592_s5, %s2935_s13, %s2935_s13, %s2941_s10  }
  0xcd   : > { %325 = sbr.rel (%p2942_p12) target bundleno = 1030 (0x406), region = 44  ;;  %s2624_s18 = sand.u32 (!%p2942_p12), 1, %s2271_s22  }
  0xce   : > { %s1879_s20 = smul.u32 (!%p2942_p12), 96, %s2624_s18  ;;  %s328_s2 = scalar_lea.sflag (!%p2942_p12), [#allocation5], %s2624_s18 }
  0xcf   : > { %p2943_p8 = scmp.ne.s32.totalorder (!%p2942_p12), %s2923_s29, 0 }
  0xd0   : > { %s2630_s28 = scalar_lea.vmem (!%p2942_p12), [#allocation4], %s1879_s20 }
  0xd4   : > { %2242 = dma.done.wait (%p2943_p8), %s328_s2, 1536  }
  0xd5   : > { %2244 = vsyncadd (%p2943_p8), %s328_s2, 4294965760  ;;  %s336_s4 = sand.u32 1, %s2376_s27   ;;  %s1740_s5 = sshll.u32 %s2624_s18, 5 }
  0xd6   : > { %s337_s7 = scalar_lea.sflag [#allocation8], %s336_s4  ;;  %s340_s13 = scalar_lea.vmem [#allocation7], %s1740_s5 }
  0xd7   : > { %2246 = dma.done.wait (%p2943_p8), %s337_s7, 512  }
  0xd8   : > { %2248 = vsyncadd (%p2943_p8), %s337_s7, 4294966784  ;;  %p2944_p7 = scmp.eq.s32.totalorder %s2376_s27, 0 }
  0xda   : > { %2250 = dma.done.wait (%p2944_p7), [#allocation8], 768   ;;  %p2945_p9 = pmov %p2944_p7 }
  0xdb   : > { %p2946_p0 = pmov %p2944_p7 }
  0xdc   : > { %2252 = vsyncadd (%p2945_p9), [#allocation8], 4294966528 }
  0xdd   : > { %2254 = dma.done.wait (%p2946_p0), [#allocation11], 1280   ;;  %p2947_p2 = pmov %p2946_p0 }
  0xde   : > { %p2948_p13 = pmov %p2946_p0 }
  0xdf   : > { %2256 = vsyncadd (%p2947_p2), [#allocation11], 4294966016 }
  0xe0   : > { %2258 = dma.done.wait (%p2948_p13), [#allocation14], 512   ;;  %p2949_p6 = pmov %p2946_p0 }
  0xe1   : > { %v2655_v0 = vld [vmem:[%s2630_s28] sm:$0xff]  ;;  %v2658_v1 = vld [vmem:[%s2630_s28 + $0x18] sm:$0xff]  ;;  %v394_v4 = vld [vmem:[%s340_s13 + $0x8] sm:$0xff]  ;;  %s2301_s27 = smov 6   ;;  %v2302_v11 = vmov 0   ;;  %s2303_s29 = smov 8  }
  0xe2   : > { %2260 = vsyncadd (%p2949_p6), [#allocation14], 4294966784  ;;  %v393_v2 = vld [vmem:[%s340_s13] sm:$0xff]  ;;  %v413_v3 = vpack.c.bf16 %v2658_v1, %v2655_v0  ;;  %v2663_v5 = vld [vmem:[%s2630_s28 + $0x8] sm:$0xff]  ;;  %530 = vmatprep.mubr.bf16.mxu1 %v2302_v11  ;;  %683 = vmatprep.mubr.bf16.mxu0 %v2302_v11  ;;  %s2304_s12 = smov 4   ;;  %vm476_vm0 = vcmask 48128  }
  0xe3   : > { %v2666_v6 = vld [vmem:[%s2630_s28 + $0x20] sm:$0xff]  ;;  %v397_v7 = vpack.c.bf16 %v394_v4, %v393_v2  ;;  %v2669_v8 = vld [vmem:[%s2630_s28 + $0x30] sm:$0xff]  ;;  %v2672_v9 = vld [vmem:[%s2630_s28 + $0x48] sm:$0xff]  ;;  %2003 = vset.pattern.permute.xlu0 %v2302_v11  ;;  %2004 = vset.pattern.permute.xlu1 %v2302_v11  ;;  %vm491_vm1 = vcmask 261120   ;;  %vm630_vm2 = vcmask 64512   ;;  %vm788_vm3 = vcmask 31744  }
  0xe4   : > { %462 = vrot.lane.b32.xlu0 %v413_v3, %s2301_s27  ;;  %v414_v10 = vpack.c.bf16 %v2666_v6, %v2663_v5  ;;  %v416_v12 = vpack.c.bf16 %v2672_v9, %v2669_v8  ;;  %v2680_v13 = vld [vmem:[%s2630_s28 + $0x38] sm:$0xff]  ;;  %v2683_v14 = vld [vmem:[%s2630_s28 + $0x50] sm:$0xff]  ;;  %v2692_v18 = vld [vmem:[%s2630_s28 + $0x28] sm:$0xff]  ;;  %s2305_s19 = smov 126   ;;  %s2306_s15 = smov 124   ;;  %vm1061_vm4 = vcmask 1031168  }
  0xe5   : > { %460 = vrot.lane.b32.xlu1 %v397_v7, %s2301_s27  ;;  %v395_v15 = vld [vmem:[%s340_s13 + $0x10] sm:$0xff]  ;;  %v396_v16 = vld [vmem:[%s340_s13 + $0x18] sm:$0xff]  ;;  %v417_v19 = vpack.c.bf16 %v2683_v14, %v2680_v13  ;;  %v2697_v20 = vld [vmem:[%s2630_s28 + $0x40] sm:$0xff]  ;;  %vm1331_vm5 = vcmask 1014784   ;;  %s2826_s0 = scalar_lea.vmem [#allocation15], %s1879_s20  ;;  %s1880_s3 = smul.u32 1536, %s2279_s24 }
  0xe6   : > { %v2689_v17 = vld [vmem:[%s2630_s28 + $0x10] sm:$0xff]  ;;  %v398_v21 = vpack.c.bf16 %v396_v16, %v395_v15  ;;  %v2700_v22 = vld [vmem:[%s2630_s28 + $0x58] sm:$0xff]  ;;  %v933_v27 = vld [vmem:[#allocation10 + $0x10] sm:$0xff]  ;;  %s1576_s11 = sshll.u32 %s2826_s0, 4  ;;  %s1561_s24 = scalar_lea.sflag [#allocation6], %s2624_s18  ;;  %s2849_s11 = int_to_ptr.vmem [resolvable:$true] %s1576_s11 }
  0xe7   : > { %v415_v23 = vpack.c.bf16 %v2692_v18, %v2689_v17  ;;  %v418_v24 = vpack.c.bf16 %v2700_v22, %v2697_v20  ;;  %v931_v25 = vld [vmem:[#allocation10] sm:$0xff]  ;;  %v932_v26 = vld [vmem:[#allocation10 + $0x8] sm:$0xff]  ;;  %v934_v28 = vld [vmem:[#allocation10 + $0x18] sm:$0xff]  ;;  %s2847_s14 = scalar_lea.hbm %s2907_s6, %s1880_s3  ;;  %s2189_s17 = scalar_lea.vmem %s2849_s11, 1536 }
  0xe8   : > { %464 = vrot.lane.b32.xlu0 %v414_v10, %s2301_s27  ;;  %v2005_v39 = vld [vmem:[#allocation9 + $0x10] sm:$0xff]   ;;  %v2006_v46 = vld [vmem:[#allocation9 + $0x18] sm:$0xff]   ;;  %v2007_v57 = vld [vmem:[#allocation9] sm:$0xff]   ;;  %p2190_p1 = scmp.ne.s32.totalorder %s2849_s11, %s2189_s17  ;;  %s2307_s10 = smov [#allocation15]  }
  0xe9   : > { %470 = vrot.lane.b32.xlu1 %v416_v12, %s2301_s27  ;;  %v2008_v4 = vld [vmem:[#allocation9 + $0x8] sm:$0xff]   ;;  %s2193_s20 = sshll.u32 %s2307_s10, 4  ;;  %s2194_s20 = int_to_ptr.vmem [resolvable:$false] %s2193_s20 }
  0xea   : > { %p2191_p4 = pnand %p2190_p1, %p2529_p5  ;;  %s2195_s2 = scalar_lea.vmem %s2194_s20, 3072 }
  0xeb   : > { %p2196_p3 = scmp.lt.s32.totalorder %s2849_s11, %s2194_s20  ;;  %p2197_p11 = scmp.lt.s32.totalorder %s2195_s2, %s2189_s17 }
  0xec   : > { %472 = vrot.lane.b32.xlu0 %v417_v19, %s2301_s27  ;;  %p2192_p10 = pneg %p2191_p4 }
  0xed   : > { %468 = vrot.lane.b32.xlu1 %v398_v21, %s2301_s27  ;;  %p2198_p12 = por %p2197_p11, %p2196_p3 }
  0xef   : > { %p2199_p8 = pnand %p2198_p12, %p2192_p10 }
  0xf0   : > { %466 = vrot.lane.b32.xlu0 %v415_v23, %s2301_s27 }
  0xf1   : > { %474 = vrot.lane.b32.xlu1 %v418_v24, %s2301_s27 }
  0xf4   : > { %616 = vrot.lane.b32.xlu0 %v413_v3, %s2303_s29 }
  0xf5   : > { %618 = vrot.lane.b32.xlu1 %v414_v10, %s2303_s29 }
  0xf8   : > { %614 = vrot.lane.b32.xlu0 %v397_v7, %s2303_s29 }
  0xf9   : > { %620 = vrot.lane.b32.xlu1 %v415_v23, %s2303_s29 }
  0xfc   : > { %624 = vrot.lane.b32.xlu0 %v416_v12, %s2303_s29 }
  0xfd   : > { %626 = vrot.lane.b32.xlu1 %v417_v19, %s2303_s29 }
 0x100   : > { %622 = vrot.lane.b32.xlu0 %v398_v21, %s2303_s29 }
 0x101   : > { %628 = vrot.lane.b32.xlu1 %v418_v24, %s2303_s29 }
 0x104   : > { %774 = vrot.lane.b32.xlu0 %v413_v3, %s2304_s12 }
 0x105   : > { %776 = vrot.lane.b32.xlu1 %v414_v10, %s2304_s12 }
 0x108   : > { %772 = vrot.lane.b32.xlu0 %v397_v7, %s2304_s12 }
 0x109   : > { %778 = vrot.lane.b32.xlu1 %v415_v23, %s2304_s12 }
 0x10c   : > { %782 = vrot.lane.b32.xlu0 %v416_v12, %s2304_s12 }
 0x10d   : > { %784 = vrot.lane.b32.xlu1 %v417_v19, %s2304_s12  ;;  %v2009_v19 = vld [vmem:[#allocation9 + $0x20] sm:$0xff]  }
 0x110   : > { %780 = vrot.lane.b32.xlu0 %v398_v21, %s2304_s12 }
 0x111   : > { %786 = vrot.lane.b32.xlu1 %v418_v24, %s2304_s12 }
 0x114   : > { %937 = vperm.xlu0 %2003, %v931_v25   ;;  %v2010_v25 = vld [vmem:[#allocation9 + $0x28] sm:$0xff]  }
 0x115   : > { %942 = vperm.xlu1 %2004, %v932_v26  }
 0x118   : > { %952 = vperm.xlu0 %2003, %v934_v28  }
 0x119   : > { %947 = vperm.xlu1 %2004, %v933_v27  }
 0x156   : > { %v463_v29 = vpop.permute.xlu0 %462 }
 0x157   : > { %v461_v30 = vpop.permute.xlu1 %460 }
 0x158   : > { %v477_v34 = vsel %vm476_vm0, %v461_v30, %v463_v29 }
 0x15a   : > { %v465_v31 = vpop.permute.xlu0 %464 }
 0x15b   : > { %v471_v32 = vpop.permute.xlu1 %470  ;;  %v478_v33 = vsel %vm476_vm0, %v463_v29, %v465_v31 }
 0x15c   : > { %498 = vmatprep.subr.bf16.mxu1 %v478_v33 }
 0x15d   : > { %499 = vmatpush1.bf16.msra.mxu1 %v477_v34 }
 0x15e   : > { %v473_v35 = vpop.permute.xlu0 %472 }
 0x15f   : > { %v469_v36 = vpop.permute.xlu1 %468  ;;  %v481_v37 = vsel %vm476_vm0, %v471_v32, %v473_v35 }
 0x160   : > { %500 = vmatprep.subr.bf16.mxu1 %v481_v37  ;;  %v480_v38 = vsel %vm476_vm0, %v469_v36, %v471_v32 }
 0x161   : > { %501 = vmatpush1.bf16.msra.mxu1 %v480_v38 }
 0x162   : > { %v467_v40 = vpop.permute.xlu0 %466 }
 0x163   : > { %v479_v41 = vsel %vm476_vm0, %v465_v31, %v467_v40  ;;  %v475_v42 = vpop.permute.xlu1 %474  ;;  %551 = vmatprep.subr.bf16.mxu1 %v467_v40 }
 0x164   : > { %1747 = vmatmul.mubr.msk.bf16.vlgmr.msra.gmra.mrb[0].mxu1 %vm491_vm1, %v2005_v39  ;;  %v482_v45 = vsel %vm476_vm0, %v473_v35, %v475_v42 }
 0x165   : > { %552 = vmatpush1.bf16.msra.mxu1 %v479_v41  ;;  %540 = vmatprep.mubr.bf16.mxu1 %v2302_v11 }
 0x166   : > { %v617_v43 = vpop.permute.xlu0 %616  ;;  %553 = vmatprep.subr.bf16.mxu1 %v475_v42 }
 0x167   : > { %v619_v44 = vpop.permute.xlu1 %618 }
 0x168   : > { %v632_v47 = vsel %vm630_vm2, %v617_v43, %v619_v44 }
 0x169   : > { %554 = vmatpush1.bf16.msra.mxu1 %v482_v45  ;;  %651 = vmatprep.subr.bf16.mxu0 %v632_v47 }
 0x16a   : > { %v615_v48 = vpop.permute.xlu0 %614 }
 0x16b   : > { %v621_v49 = vpop.permute.xlu1 %620  ;;  %v631_v50 = vsel %vm630_vm2, %v615_v48, %v617_v43 }
 0x16c   : > { %1748 = vmatmul.mubr.msk.bf16.gmra.mrb[4].mxu1 %vm491_vm1, %v2006_v46  ;;  %652 = vmatpush1.bf16.msra.mxu0 %v631_v50  ;;  %v633_v58 = vsel %vm630_vm2, %v619_v44, %v621_v49 }
 0x16d   : > { %583 = vmatprep.mubr.bf16.mxu1 %v2302_v11  ;;  %704 = vmatprep.subr.bf16.mxu1 %v621_v49 }
 0x16e   : > { %v625_v51 = vpop.permute.xlu0 %624 }
 0x16f   : > { %v627_v52 = vpop.permute.xlu1 %626 }
 0x170   : > { %v635_v53 = vsel %vm630_vm2, %v625_v51, %v627_v52 }
 0x171   : > { %653 = vmatprep.subr.bf16.mxu0 %v635_v53 }
 0x172   : > { %v623_v54 = vpop.permute.xlu0 %622 }
 0x173   : > { %v634_v55 = vsel %vm630_vm2, %v623_v54, %v625_v51  ;;  %v629_v56 = vpop.permute.xlu1 %628 }
 0x174   : > { %1749 = vmatmul.mubr.msk.bf16.vlgmr.msra.gmra.mrb[8].mxu1 %vm491_vm1, %v2005_v39  ;;  %654 = vmatpush1.bf16.msra.mxu0 %v634_v55  ;;  %v636_v61 = vsel %vm630_vm2, %v627_v52, %v629_v56 }
 0x175   : > { %705 = vmatpush1.bf16.msra.mxu1 %v633_v58  ;;  %593 = vmatprep.mubr.bf16.mxu1 %v2302_v11 }
 0x176   : > { %v775_v59 = vpop.permute.xlu0 %774  ;;  %706 = vmatprep.subr.bf16.mxu1 %v629_v56 }
 0x177   : > { %1753 = vmatmul.mubr.msk.bf16.vlgmr.msra.gmra.mrb[0].mxu0 %vm491_vm1, %v2007_v57  ;;  %v777_v60 = vpop.permute.xlu1 %776 }
 0x178   : > { %693 = vmatprep.mubr.bf16.mxu0 %v2302_v11  ;;  %v790_v62 = vsel %vm788_vm3, %v775_v59, %v777_v60 }
 0x179   : > { %707 = vmatpush1.bf16.msra.mxu1 %v636_v61  ;;  %809 = vmatprep.subr.bf16.mxu0 %v790_v62 }
 0x17a   : > { %v773_v63 = vpop.permute.xlu0 %772 }
 0x17b   : > { %v789_v2 = vsel %vm788_vm3, %v773_v63, %v775_v59  ;;  %v779_v3 = vpop.permute.xlu1 %778 }
 0x17c   : > { %1750 = vmatmul.mubr.msk.bf16.gmra.mrb[12].mxu1 %vm491_vm1, %v2006_v46  ;;  %810 = vmatpush1.bf16.msra.mxu0 %v789_v2  ;;  %v791_v21 = vsel %vm788_vm3, %v777_v60, %v779_v3 }
 0x17d   : > { %736 = vmatprep.mubr.bf16.mxu1 %v2302_v11  ;;  %862 = vmatprep.subr.bf16.mxu1 %v779_v3 }
 0x17e   : > { %v783_v7 = vpop.permute.xlu0 %782 }
 0x17f   : > { %1754 = vmatmul.mubr.msk.bf16.gmra.mrb[4].mxu0 %vm491_vm1, %v2008_v4  ;;  %v785_v10 = vpop.permute.xlu1 %784 }
 0x180   : > { %v793_v12 = vsel %vm788_vm3, %v783_v7, %v785_v10  ;;  %841 = vmatprep.mubr.bf16.mxu0 %v2302_v11 }
 0x181   : > { %811 = vmatprep.subr.bf16.mxu0 %v793_v12 }
 0x182   : > { %v781_v15 = vpop.permute.xlu0 %780 }
 0x183   : > { %v792_v16 = vsel %vm788_vm3, %v781_v15, %v783_v7  ;;  %v787_v23 = vpop.permute.xlu1 %786 }
 0x184   : > { %1755 = vmatmul.mubr.msk.bf16.vlgmr.msra.gmra.mrb[8].mxu1 %vm491_vm1, %v2007_v57  ;;  %812 = vmatpush1.bf16.msra.mxu0 %v792_v16  ;;  %v794_v24 = vsel %vm788_vm3, %v785_v10, %v787_v23 }
 0x185   : > { %863 = vmatpush1.bf16.msra.mxu1 %v791_v21  ;;  %746 = vmatprep.mubr.bf16.mxu1 %v2302_v11 }
 0x186   : > { %864 = vmatprep.subr.bf16.mxu1 %v787_v23 }
 0x187   : > { %1759 = vmatmul.mubr.msk.bf16.vlgmr.msra.gmra.mrb[0].mxu0 %vm491_vm1, %v2009_v19 }
 0x188   : > { %851 = vmatprep.mubr.bf16.mxu0 %v2302_v11 }
 0x189   : > { %865 = vmatpush1.bf16.msra.mxu1 %v794_v24 }
 0x18c   : > { %1756 = vmatmul.mubr.msk.bf16.gmra.mrb[12].mxu1 %vm491_vm1, %v2008_v4 }
 0x18d   : > { %894 = vmatprep.mubr.bf16.mxu1 %v2302_v11 }
 0x18f   : > { %1760 = vmatmul.mubr.msk.bf16.gmra.mrb[4].mxu0 %vm491_vm1, %v2010_v25 }
 0x190   : > { %1112 = vmatprep.mubr.bf16.mxu0 %v2302_v11 }
 0x193   : > { %v938_v35 = vpop.permute.xlu0 %937 }
 0x194   : > { %1761 = vmatmul.mubr.msk.bf16.vlgmr.msra.gmra.mrb[8].mxu1 %vm491_vm1, %v2009_v19  ;;  %v943_v40 = vpop.permute.xlu1 %942 }
 0x195   : > { %904 = vmatprep.mubr.bf16.mxu1 %v2302_v11 }
 0x197   : > { %v953_v3 = vpop.permute.xlu0 %952 }
 0x198   : > { %v948_v53 = vpop.permute.xlu1 %947 }
 0x19c   : > { %1762 = vmatmul.mubr.msk.bf16.gmra.mrb[12].mxu1 %vm491_vm1, %v2010_v25 }
 0x237   : > { %v532_v26 = vpop.f32.mrb[0].mxu1 }
 0x238   : > { %v534_v27 = vpop.f32.mrb[1].mxu1 }
 0x239   : > { %v536_v28 = vpop.f32.mrb[2].mxu1 }
 0x23a   : > { %v538_v29 = vpop.f32.mrb[3].mxu1 }
 0x23f   : > { %v542_v30 = vpop.f32.mrb[4].mxu1 }
 0x240   : > { %v544_v31 = vpop.f32.mrb[5].mxu1 }
 0x241   : > { %v546_v32 = vpop.f32.mrb[6].mxu1 }
 0x242   : > { %v548_v33 = vpop.f32.mrb[7].mxu1 }
 0x25a   : > { %v843_v34 = vpop.f32.mrb[0].mxu0 }
 0x25b   : > { %v1821_v36 = vadd.f32 %v843_v34, %v532_v26  ;;  %v845_v37 = vpop.f32.mrb[1].mxu0 }
 0x25c   : > { %v1822_v38 = vadd.f32 %v845_v37, %v534_v27  ;;  %v847_v39 = vpop.f32.mrb[2].mxu0 }
 0x25d   : > { %v955_v41 = vadd.f32 %v1821_v36, %v938_v35  ;;  %v1823_v42 = vadd.f32 %v847_v39, %v536_v28  ;;  %v849_v43 = vpop.f32.mrb[3].mxu0  ;;  %v2011_v39 = vld [vmem:[#allocation12 + $0x10] sm:$0xff]  }
 0x25e   : > { %v956_v44 = vadd.f32 %v1822_v38, %v938_v35  ;;  %v1824_v45 = vadd.f32 %v849_v43, %v538_v29  ;;  %1801 = vmatprep.mubr.msk.bf16.mxu1 %vm491_vm1, %v2011_v39 }
 0x25f   : > { %v959_v46 = vadd.f32 %v1823_v42, %v943_v40  ;;  %v971_v48 = vmax.f32 %v955_v41, 0.0 }
 0x260   : > { %v960_v47 = vadd.f32 %v1824_v45, %v943_v40  ;;  %v972_v50 = vmax.f32 %v956_v44, 0.0 }
 0x261   : > { %v975_v49 = vmax.f32 %v959_v46, 0.0 }
 0x262   : > { %v976_v51 = vmax.f32 %v960_v47, 0.0  ;;  %v853_v52 = vpop.f32.mrb[4].mxu0 }
 0x263   : > { %v987_v54 = vpack.c.bf16 %v975_v49, %v971_v48  ;;  %v1825_v55 = vadd.f32 %v853_v52, %v542_v30  ;;  %v855_v56 = vpop.f32.mrb[5].mxu0 }
 0x264   : > { %v2747_v57 = vpack.c.bf16 %v976_v51, %v972_v50  ;;  %v1826_v58 = vadd.f32 %v855_v56, %v544_v31  ;;  %v857_v59 = vpop.f32.mrb[6].mxu0  ;;  %v1464_v56 = vld [vmem:[#allocation13] sm:$0xff] }
 0x265   : > { %995 = vst [vmem:[#allocation3] sm:$0xff] %v987_v54  ;;  %v1827_v60 = vadd.f32 %v857_v59, %v546_v32  ;;  %v963_v61 = vadd.f32 %v1825_v55, %v948_v53  ;;  %v859_v62 = vpop.f32.mrb[7].mxu0  ;;  %v1465_v59 = vld [vmem:[#allocation13 + $0x8] sm:$0xff] }
 0x266   : > { %1008 = vst.msk [vmem:[#allocation3] sm:$0xff] %vm788_vm3, %v2302_v11  ;;  %v964_v63 = vadd.f32 %v1826_v58, %v948_v53  ;;  %v1828_v2 = vadd.f32 %v859_v62, %v548_v33  ;;  %1047 = vrot.lane.b32.xlu1 %v2747_v57, %s2305_s19  ;;  %v1466_v58 = vld [vmem:[#allocation13 + $0x10] sm:$0xff] }
 0x267   : > { %v967_v4 = vadd.f32 %v1827_v60, %v953_v3  ;;  %v896_v7 = vpop.f32.mrb[8].mxu1  ;;  %v979_v16 = vmax.f32 %v963_v61, 0.0  ;;  %v1467_v60 = vld [vmem:[#allocation13 + $0x18] sm:$0xff] }
 0x268   : > { %v968_v10 = vadd.f32 %v1828_v2, %v953_v3  ;;  %v957_v12 = vadd.f32 %v938_v35, %v896_v7  ;;  %v898_v15 = vpop.f32.mrb[9].mxu1  ;;  %v980_v24 = vmax.f32 %v964_v63, 0.0 }
 0x269   : > { %v983_v19 = vmax.f32 %v967_v4, 0.0  ;;  %v958_v21 = vadd.f32 %v938_v35, %v898_v15  ;;  %v900_v23 = vpop.f32.mrb[10].mxu1 }
 0x26a   : > { %v984_v25 = vmax.f32 %v968_v10, 0.0  ;;  %v961_v26 = vadd.f32 %v943_v40, %v900_v23  ;;  %v902_v27 = vpop.f32.mrb[11].mxu1  ;;  %v973_v31 = vmax.f32 %v957_v12, 0.0 }
 0x26b   : > { %v991_v28 = vpack.c.bf16 %v983_v19, %v979_v16  ;;  %v962_v29 = vadd.f32 %v943_v40, %v902_v27  ;;  %v974_v33 = vmax.f32 %v958_v21, 0.0 }
 0x26c   : > { %v2753_v30 = vpack.c.bf16 %v984_v25, %v980_v24  ;;  %v977_v32 = vmax.f32 %v961_v26, 0.0  ;;  %v2012_v25 = vld [vmem:[#allocation12 + $0x18] sm:$0xff]  }
 0x26d   : > { %1000 = vst [vmem:[#allocation3 + $0x20] sm:$0xff] %v991_v28  ;;  %v978_v34 = vmax.f32 %v962_v29, 0.0  ;;  %v2755_v36 = vld [vmem:[#allocation3] sm:$0xff]  ;;  %v2013_v28 = vld [vmem:[#allocation12] sm:$0xff]  }
 0x26e   : > { %1009 = vst.msk [vmem:[#allocation3 + $0x20] sm:$0xff] %vm788_vm3, %v2302_v11  ;;  %v2759_v35 = vpack.c.bf16 %v977_v32, %v973_v31  ;;  %1045 = vrot.lane.b32.xlu1 %v2755_v36, %s2305_s19 }
 0x26f   : > { %v990_v37 = vpack.c.bf16 %v978_v34, %v974_v33  ;;  %v906_v38 = vpop.f32.mrb[12].mxu1 }
 0x270   : > { %v965_v40 = vadd.f32 %v948_v53, %v906_v38  ;;  %v908_v41 = vpop.f32.mrb[13].mxu1  ;;  %1049 = vrot.lane.b32.xlu0 %v2759_v35, %s2305_s19 }
 0x271   : > { %999 = vst.msk [vmem:[#allocation3 + $0x18] sm:$0xff] %vm788_vm3, %v990_v37  ;;  %v966_v42 = vadd.f32 %v948_v53, %v908_v41  ;;  %v910_v43 = vpop.f32.mrb[14].mxu1  ;;  %v2015_v37 = vld [vmem:[#allocation12 + $0x20] sm:$0xff]   ;;  %v2016_v41 = vld [vmem:[#allocation12 + $0x28] sm:$0xff]  }
 0x272   : > { %v969_v44 = vadd.f32 %v953_v3, %v910_v43  ;;  %v912_v45 = vpop.f32.mrb[15].mxu1  ;;  %v981_v47 = vmax.f32 %v965_v40, 0.0 }
 0x273   : > { %v970_v46 = vadd.f32 %v953_v3, %v912_v45  ;;  %v982_v49 = vmax.f32 %v966_v42, 0.0 }
 0x274   : > { %v985_v48 = vmax.f32 %v969_v44, 0.0  ;;  %1055 = vrot.lane.b32.xlu0 %v2753_v30, %s2305_s19 }
 0x275   : > { %v986_v50 = vmax.f32 %v970_v46, 0.0  ;;  %v1017_v51 = vld [vmem:[#allocation3 + $0x20] sm:$0xff] }
 0x276   : > { %v2769_v52 = vpack.c.bf16 %v985_v48, %v981_v47 }
 0x277   : > { %v994_v54 = vpack.c.bf16 %v986_v50, %v982_v49 }
 0x278   : > { %1053 = vrot.lane.b32.xlu0 %v1017_v51, %s2305_s19  ;;  %1057 = vrot.lane.b32.xlu1 %v2769_v52, %s2305_s19  ;;  %v1025_v53 = vld [vmem:[#allocation3 + $0x18] sm:$0xff] }
 0x279   : > { %1003 = vst.msk [vmem:[#allocation3 + $0x38] sm:$0xff] %vm788_vm3, %v994_v54 }
 0x27c   : > { %1051 = vrot.lane.b32.xlu1 %v1025_v53, %s2305_s19 }
 0x280   : > { %v1026_v55 = vld [vmem:[#allocation3 + $0x38] sm:$0xff]  ;;  %1317 = vrot.lane.b32.xlu1 %v2747_v57, %s2306_s15 }
 0x281   : > { %1059 = vrot.lane.b32.xlu0 %v1026_v55, %s2305_s19 }
 0x284   : > { %1315 = vrot.lane.b32.xlu1 %v2755_v36, %s2306_s15 }
 0x285   : > { %1319 = vrot.lane.b32.xlu0 %v2759_v35, %s2306_s15 }
 0x288   : > { %1327 = vrot.lane.b32.xlu1 %v2769_v52, %s2306_s15 }
 0x289   : > { %1325 = vrot.lane.b32.xlu0 %v2753_v30, %s2306_s15 }
 0x28c   : > { %1321 = vrot.lane.b32.xlu1 %v1025_v53, %s2306_s15 }
 0x28d   : > { %1323 = vrot.lane.b32.xlu0 %v1017_v51, %s2306_s15 }
 0x290   : > { %1470 = vperm.xlu1 %2004, %v1464_v56  }
 0x291   : > { %1329 = vrot.lane.b32.xlu0 %v1026_v55, %s2306_s15 }
 0x294   : > { %1480 = vperm.xlu1 %2004, %v1466_v58  }
 0x295   : > { %1475 = vperm.xlu0 %2003, %v1465_v59  }
 0x299   : > { %1485 = vperm.xlu0 %2003, %v1467_v60  }
 0x2d8   : > { %v1048_v61 = vpop.permute.xlu1 %1047 }
 0x2e0   : > { %v1046_v62 = vpop.permute.xlu1 %1045 }
 0x2e1   : > { %v1062_v3 = vsel %vm1061_vm4, %v1046_v62, %v1048_v61 }
 0x2e2   : > { %v1050_v63 = vpop.permute.xlu0 %1049 }
 0x2e3   : > { %v1063_v2 = vsel %vm1061_vm4, %v1048_v61, %v1050_v63 }
 0x2e4   : > { %1080 = vmatprep.subr.bf16.mxu0 %v1063_v2 }
 0x2e5   : > { %1081 = vmatpush1.bf16.msra.mxu0 %v1062_v3 }
 0x2e6   : > { %v1056_v4 = vpop.permute.xlu0 %1055 }
 0x2ea   : > { %v1054_v7 = vpop.permute.xlu0 %1053  ;;  %v1058_v10 = vpop.permute.xlu1 %1057 }
 0x2eb   : > { %v1065_v12 = vsel %vm1061_vm4, %v1054_v7, %v1056_v4  ;;  %v1066_v15 = vsel %vm1061_vm4, %v1056_v4, %v1058_v10 }
 0x2ec   : > { %1082 = vmatprep.subr.bf16.mxu0 %v1066_v15 }
 0x2ed   : > { %1083 = vmatpush1.bf16.msra.mxu0 %v1065_v12 }
 0x2ee   : > { %1198 = vmatprep.subr.bf16.mxu0 %v2747_v57  ;;  %v1052_v16 = vpop.permute.xlu1 %1051 }
 0x2ef   : > { %v1064_v19 = vsel %vm1061_vm4, %v1050_v63, %v1052_v16 }
 0x2f0   : > { %1765 = vmatmul.mubr.msk.bf16.vlgmr.msra.gmra.mrb[8].mxu0 %vm491_vm1, %v2011_v39  ;;  %1797 = vmatprep.subr.bf16.mxu1 %v1064_v19 }
 0x2f1   : > { %1798 = vmatpush3.bf16.msra.mxu1 %v1064_v19  ;;  %1199 = vmatpush1.bf16.msra.mxu0 %v2755_v36 }
 0x2f2   : > { %1200 = vmatprep.subr.bf16.mxu0 %v2753_v30  ;;  %v1318_v21 = vpop.permute.xlu1 %1317  ;;  %1122 = vmatprep.mubr.bf16.mxu0 %v2302_v11 }
 0x2f3   : > { %v1060_v23 = vpop.permute.xlu0 %1059 }
 0x2f4   : > { %v1067_v24 = vsel %vm1061_vm4, %v1058_v10, %v1060_v23 }
 0x2f5   : > { %1799 = vmatprep.subr.bf16.mxu1 %v1067_v24  ;;  %1201 = vmatpush1.bf16.msra.mxu0 %v1017_v51 }
 0x2f6   : > { %1800 = vmatpush3.bf16.msra.mxu1 %v1067_v24  ;;  %v1316_v57 = vpop.permute.xlu1 %1315 }
 0x2f7   : > { %v1320_v26 = vpop.permute.xlu0 %1319  ;;  %1805 = vmatprep.subr.bf16.mxu1 %v2759_v35  ;;  %v1332_v34 = vsel %vm1331_vm5, %v1316_v57, %v1318_v21 }
 0x2f8   : > { %v1333_v27 = vsel %vm1331_vm5, %v1318_v21, %v1320_v26  ;;  %1766 = vmatmul.mubr.msk.bf16.gmra.mrb[12].mxu0 %vm491_vm1, %v2012_v25 }
 0x2f9   : > { %1350 = vmatprep.subr.bf16.mxu0 %v1333_v27  ;;  %1802 = vmatmul.mubr.msk.bf16.vlgmr.msra.gmra.mrb[16].mxu1 %vm491_vm1, %v2012_v25 }
 0x2fa   : > { %1806 = vmatpush3.bf16.msra.mxu1 %v2759_v35  ;;  %v1328_v29 = vpop.permute.xlu1 %1327  ;;  %1230 = vmatprep.mubr.bf16.mxu0 %v2302_v11  ;;  %v2014_v35 = vld [vmem:[#allocation12 + $0x8] sm:$0xff]  }
 0x2fb   : > { %v1326_v30 = vpop.permute.xlu0 %1325  ;;  %1807 = vmatprep.subr.bf16.mxu1 %v2769_v52  ;;  %1809 = vmatprep.mubr.msk.bf16.mxu1 %vm491_vm1, %v2013_v28 }
 0x2fc   : > { %v1336_v36 = vsel %vm1331_vm5, %v1326_v30, %v1328_v29 }
 0x2fe   : > { %1808 = vmatpush3.bf16.msra.mxu1 %v2769_v52  ;;  %v1322_v31 = vpop.permute.xlu1 %1321 }
 0x2ff   : > { %v1324_v32 = vpop.permute.xlu0 %1323  ;;  %v1334_v33 = vsel %vm1331_vm5, %v1320_v26, %v1322_v31 }
 0x300   : > { %1771 = vmatmul.mubr.msk.bf16.vlgmr.msra.gmra.mrb[8].mxu0 %vm491_vm1, %v2013_v28  ;;  %1813 = vmatprep.subr.bf16.mxu1 %v1334_v33  ;;  %v1335_v39 = vsel %vm1331_vm5, %v1324_v32, %v1326_v30 }
 0x301   : > { %1351 = vmatpush1.bf16.msra.mxu0 %v1332_v34  ;;  %1240 = vmatprep.mubr.bf16.mxu0 %v2302_v11 }
 0x302   : > { %1352 = vmatprep.subr.bf16.mxu0 %v1336_v36 }
 0x303   : > { %v1330_v38 = vpop.permute.xlu0 %1329 }
 0x304   : > { %v1337_v40 = vsel %vm1331_vm5, %v1328_v29, %v1330_v38 }
 0x305   : > { %1810 = vmatmul.mubr.msk.bf16.vlgmr.msra.gmra.mrb[16].mxu1 %vm491_vm1, %v2014_v35  ;;  %1353 = vmatpush1.bf16.msra.mxu0 %v1335_v39 }
 0x306   : > { %1814 = vmatpush3.bf16.msra.mxu1 %v1334_v33  ;;  %1817 = vmatprep.mubr.msk.bf16.mxu1 %vm491_vm1, %v2015_v37 }
 0x307   : > { %1815 = vmatprep.subr.bf16.mxu1 %v1337_v40 }
 0x308   : > { %1772 = vmatmul.mubr.msk.bf16.gmra.mrb[12].mxu0 %vm491_vm1, %v2014_v35 }
 0x309   : > { %1382 = vmatprep.mubr.bf16.mxu0 %v2302_v11 }
 0x30a   : > { %1816 = vmatpush3.bf16.msra.mxu1 %v1337_v40 }
 0x30f   : > { %v1471_v42 = vpop.permute.xlu1 %1470 }
 0x310   : > { %1777 = vmatmul.mubr.msk.bf16.vlgmr.msra.gmra.mrb[8].mxu0 %vm491_vm1, %v2015_v37 }
 0x311   : > { %1818 = vmatmul.mubr.msk.bf16.vlgmr.msra.gmra.mrb[16].mxu1 %vm491_vm1, %v2016_v41  ;;  %1392 = vmatprep.mubr.bf16.mxu0 %v2302_v11 }
 0x313   : > { %v1481_v44 = vpop.permute.xlu1 %1480 }
 0x314   : > { %v1476_v43 = vpop.permute.xlu0 %1475 }
 0x318   : > { %1778 = vmatmul.mubr.msk.bf16.gmra.mrb[12].mxu0 %vm491_vm1, %v2016_v41  ;;  %v1486_v45 = vpop.permute.xlu0 %1485 }
 0x3e3   : > { %v1384_v46 = vpop.f32.mrb[8].mxu0 }
 0x3e4   : > { %v1488_v47 = vadd.f32 %v1471_v42, %v1384_v46  ;;  %v1819_v48 = vpop.f32.mrb[16].mxu1  ;;  %v1386_v49 = vpop.f32.mrb[9].mxu0 }
 0x3e5   : > { %v1496_v50 = vadd.f32 %v1819_v48, %v1481_v44  ;;  %v1489_v51 = vadd.f32 %v1471_v42, %v1386_v49  ;;  %v1437_v52 = vpop.f32.mrb[17].mxu1  ;;  %v1388_v54 = vpop.f32.mrb[10].mxu0 }
 0x3e6   : > { %v1500_v53 = vmax.f32 %v1488_v47, 0.0  ;;  %v1490_v55 = vadd.f32 %v1471_v42, %v1437_v52  ;;  %v1491_v56 = vadd.f32 %v1476_v43, %v1388_v54  ;;  %v1820_v58 = vpop.f32.mrb[18].mxu1  ;;  %v1390_v59 = vpop.f32.mrb[11].mxu0 }
 0x3e7   : > { %v1508_v11 = vmax.f32 %v1496_v50, 0.0  ;;  %v1501_v60 = vmax.f32 %v1489_v51, 0.0  ;;  %v1499_v61 = vadd.f32 %v1820_v58, %v1486_v45  ;;  %v1492_v62 = vadd.f32 %v1476_v43, %v1390_v59  ;;  %v1440_v63 = vpop.f32.mrb[19].mxu1 }
 0x3e8   : > { %v1524_v2 = vadd.f32 %v1500_v53, %v2655_v0  ;;  %v1502_v3 = vmax.f32 %v1490_v55, 0.0  ;;  %v1503_v4 = vmax.f32 %v1491_v56, 0.0  ;;  %v1493_v7 = vadd.f32 %v1476_v43, %v1440_v63 }
 0x3e9   : > { %v1532_v10 = vadd.f32 %v1508_v11, %v2697_v20  ;;  %v1525_v12 = vadd.f32 %v1501_v60, %v2663_v5  ;;  %v1511_v15 = vmax.f32 %v1499_v61, 0.0  ;;  %v1504_v16 = vmax.f32 %v1492_v62, 0.0 }
 0x3ea   : > { %v1536_v19 = vmax.f32 %v1524_v2, 0.0  ;;  %v1526_v21 = vadd.f32 %v1502_v3, %v2689_v17  ;;  %v1527_v23 = vadd.f32 %v1503_v4, %v2658_v1  ;;  %v1505_v24 = vmax.f32 %v1493_v7, 0.0 }
 0x3eb   : > { %v1544_v25 = vmax.f32 %v1532_v10, 0.0  ;;  %v1537_v57 = vmax.f32 %v1525_v12, 0.0  ;;  %v1535_v0 = vadd.f32 %v1511_v15, %v2700_v22  ;;  %v1528_v26 = vadd.f32 %v1504_v16, %v2666_v6  ;;  %v1394_v27 = vpop.f32.mrb[12].mxu0 }
 0x3ec   : > { %1548 = vst [vmem:[%s2826_s0] sm:$0xff] %v1536_v19  ;;  %v1538_v5 = vmax.f32 %v1526_v21, 0.0  ;;  %v1539_v17 = vmax.f32 %v1527_v23, 0.0  ;;  %v1529_v1 = vadd.f32 %v1505_v24, %v2692_v18  ;;  %v1494_v20 = vadd.f32 %v1481_v44, %v1394_v27  ;;  %v1396_v22 = vpop.f32.mrb[13].mxu0 }
 0x3ed   : > { %1556 = vst [vmem:[%s2826_s0 + $0x40] sm:$0xff] %v1544_v25  ;;  %1549 = vst [vmem:[%s2826_s0 + $0x8] sm:$0xff] %v1537_v57  ;;  %v1547_v6 = vmax.f32 %v1535_v0, 0.0  ;;  %v1540_v28 = vmax.f32 %v1528_v26, 0.0  ;;  %v1495_v29 = vadd.f32 %v1481_v44, %v1396_v22  ;;  %v1398_v30 = vpop.f32.mrb[14].mxu0 }
 0x3ee   : > { %1550 = vst [vmem:[%s2826_s0 + $0x10] sm:$0xff] %v1538_v5  ;;  %1551 = vst [vmem:[%s2826_s0 + $0x18] sm:$0xff] %v1539_v17  ;;  %v1541_v31 = vmax.f32 %v1529_v1, 0.0  ;;  %v1506_v32 = vmax.f32 %v1494_v20, 0.0  ;;  %v1497_v33 = vadd.f32 %v1486_v45, %v1398_v30  ;;  %v1400_v34 = vpop.f32.mrb[15].mxu0 }
 0x3ef   : > { %1559 = vst [vmem:[%s2826_s0 + $0x58] sm:$0xff] %v1547_v6  ;;  %1552 = vst [vmem:[%s2826_s0 + $0x20] sm:$0xff] %v1540_v28  ;;  %v1507_v18 = vmax.f32 %v1495_v29, 0.0  ;;  %v1498_v36 = vadd.f32 %v1486_v45, %v1400_v34 }
 0x3f0   : > { %1553 = vst [vmem:[%s2826_s0 + $0x28] sm:$0xff] %v1541_v31  ;;  %v1530_v35 = vadd.f32 %v1506_v32, %v2669_v8  ;;  %v1509_v37 = vmax.f32 %v1497_v33, 0.0 }
 0x3f1   : > { %v1531_v38 = vadd.f32 %v1507_v18, %v2680_v13  ;;  %v1510_v39 = vmax.f32 %v1498_v36, 0.0 }
 0x3f2   : > { %v1542_v40 = vmax.f32 %v1530_v35, 0.0  ;;  %v1533_v41 = vadd.f32 %v1509_v37, %v2672_v9 }
 0x3f3   : > { %v1543_v42 = vmax.f32 %v1531_v38, 0.0  ;;  %v1534_v43 = vadd.f32 %v1510_v39, %v2683_v14 }
 0x3f4   : > { %1554 = vst [vmem:[%s2826_s0 + $0x30] sm:$0xff] %v1542_v40  ;;  %v1545_v44 = vmax.f32 %v1533_v41, 0.0 }
 0x3f5   : > { %1555 = vst [vmem:[%s2826_s0 + $0x38] sm:$0xff] %v1543_v42  ;;  %v1546_v8 = vmax.f32 %v1534_v43, 0.0 }
 0x3f6   : > { %1557 = vst [vmem:[%s2826_s0 + $0x48] sm:$0xff] %v1545_v44 }
 0x3f7   : > { %1558 = vst [vmem:[%s2826_s0 + $0x50] sm:$0xff] %v1546_v8 }
 0x3f8   : > { %2202 = shalt.err (!%p2199_p8)
}
 0x3f9   : > { %s2203_s28 = scalar_lea.hbm %s2847_s14, 1536  ;;  %s2207_s7 = scalar_lea.hbm %s2907_s6, 3072 }
 0x3fa   : > { %p2204_p7 = scmp.ne.s32.totalorder %s2847_s14, %s2203_s28  ;;  %p2208_p2 = scmp.lt.u32.totalorder %s2847_s14, %s2907_s6 }
 0x3fb   : > { %p2209_p13 = scmp.lt.u32.totalorder %s2207_s7, %s2203_s28  ;;  %p2211_p1 = scmp.lt.u32.totalorder %s2203_s28, %s2847_s14 }
 0x3fc   : > { %p2205_p9 = pnand %p2204_p7, %p2529_p5 }
 0x3fd   : > { %p2210_p6 = por %p2209_p13, %p2208_p2 }
 0x3fe   : > { %p2206_p0 = pneg %p2205_p9 }
 0x3ff   : > { %p2212_p4 = por %p2211_p1, %p2210_p6 }
 0x401   : > { %p2213_p10 = pnand %p2212_p4, %p2206_p0 }
 0x403   : > { %2216 = shalt.err (!%p2213_p10)
}
 0x404   : > { %s2308_s29 = smov 384   ;;  %s2309_s12 = smov 24  }
 0x405   : > { %1901 = dma.vmem_to_hbm [thread:$0]  (%p2529_p5), %s2849_s11, 1536, %s2847_s14, %s1561_s24, %s2308_s29, %s2308_s29, %s2309_s12  }
 0x406 PF: > { %s2950_s19 = sld [smem:[#allocation22_spill]]  ;;  %s1591_s15 = sand.u32 1, %s2267_s21  }
 0x407   : > { %p2952_p11 = scmp.ge.s32.totalorder %s2287_s26, 2  ;;  %s1592_s0 = scalar_lea.sflag [#allocation6], %s1591_s15 }
 0x40c   : > { %p2951_p3 = scmp.ne.s32.totalorder %s2950_s19, 0 }
 0x40e   : > { %p1924_p12 = pnand %p2952_p11, %p2951_p3 }
 0x410   : > { %2262 = dma.done.wait (!%p1924_p12), %s1592_s0, 1536  }
 0x411   : > { %2264 = vsyncadd (!%p1924_p12), %s1592_s0, 4294965760  ;;  %s27_s26 = sadd.s32 1, %s2287_s26   ;;  %s2953_s16 = sld [smem:[#allocation23_spill]] }
 0x412   : > { %p24_p8 = scmp.ge.s32.totalorder %s27_s26, 4   ;;  %s2954_s21 = smov %s2271_s22 }
 0x413   : > { %s2955_s22 = smov %s2275_s23  ;;  %s2956_s23 = smov %s2544_s9 }
 0x414   : > { %s2957_s24 = smov %s2283_s25  ;;  %26 = sbr.rel (!%p24_p8) target bundleno = 16 (0x10), region = 126 }
 0x417   : > { %s2958_s25 = smov %s2953_s16 }
 0x41b   :  { %1597 = vsyncpa [#allocation5], 1 }
 0x41c   :  { %1599 = vsyncpa [#allocation5 + $0x1], 1 }
 0x41d   :  { %1600 = vsyncpa [#allocation8], 1 }
 0x41e   :  { %1602 = vsyncpa [#allocation8 + $0x1], 1 }
 0x41f   :  { %1603 = vsyncpa [#allocation11], 1 }
 0x420   :  { %1604 = vsyncpa [#allocation14], 1 }
 0x421   :  { %1605 = vsyncpa [#allocation6], 1 }
 0x422   :  { %1607 = vsyncpa [#allocation6 + $0x1], 1 }

</bundles_post_ra>
